<compile_context>
chip_gen: v5e
topology: v5e:2x2
jax: 0.10.0
libtpu: 0.0.40
codegen_flags: <defaults>
</compile_context>

<pallas_src>
import functools

import jax
import jax.numpy as jnp
from jax import lax
from jax.experimental import pallas as pl
from jax.experimental.pallas import tpu as pltpu

_NEG_BIG = -1e30  # finite "-inf": exp underflows to 0 and 0 * _NEG_BIG stays finite


def _round_up(x, m):
    return ((x + m - 1) // m) * m


# --------------------------------------------------------------------------
# Kernel: grid = (batch tiles ["parallel"], class tiles ["arbitrary"]).
# --------------------------------------------------------------------------
def _myloss_kernel(pred_ref, tar_ref, out_ref, m_s, l_s, s_s, n_s, *,
                   B, C, tile_b, tile_c):
    i = pl.program_id(0)   # batch-tile index
    j = pl.program_id(1)   # class-tile index (reduction)

    @pl.when(j == 0)
    def _init():
        m_s[...] = jnp.full_like(m_s, -jnp.inf)   # lane-wise running max
        l_s[...] = jnp.zeros_like(l_s)            # lane-wise running sum exp(p - m)
        s_s[...] = jnp.zeros_like(s_s)            # lane-wise running sum mask*p
        n_s[...] = jnp.zeros_like(n_s)            # lane-wise running mask count

    p = pred_ref[...].astype(jnp.float32)         # (tile_b, tile_c)
    is_one = tar_ref[...] == 1                    # bool, in-kernel compare

    # Mask ragged / out-of-range class columns (no wrapper-side jnp.pad):
    # out-of-bounds tail of a ragged block is undefined memory.
    col = j * tile_c + lax.broadcasted_iota(jnp.int32, (tile_b, tile_c), 1)
    col_ok = col < C
    p = jnp.where(col_ok, p, _NEG_BIG)
    t = (col_ok & is_one).astype(jnp.float32)

    # ---- lane-wise (VPU/EUP-only) accumulation over static 128-lane chunks ----
    nchunks = tile_c // 128
    m_old = m_s[...]
    m_new = m_old
    for c in range(nchunks):
        m_new = jnp.maximum(m_new, p[:, c * 128:(c + 1) * 128])
    alpha = jnp.exp(m_old - m_new)                # single rescale exp per step
    l_acc = alpha * l_s[...]
    s_acc = s_s[...]
    n_acc = n_s[...]
    for c in range(nchunks):
        pc = p[:, c * 128:(c + 1) * 128]
        tc_ = t[:, c * 128:(c + 1) * 128]
        l_acc = l_acc + jnp.exp(pc - m_new)
        s_acc = s_acc + tc_ * pc
        n_acc = n_acc + tc_
    m_s[...] = m_new
    l_s[...] = l_acc
    s_s[...] = s_acc
    n_s[...] = n_acc

    # ---- finalize: the only cross-lane (XLU) work, once per batch tile ----
    @pl.when(j == pl.num_programs(1) - 1)
    def _finalize():
        m_l = m_s[...]
        row_max = jnp.max(m_l, axis=-1, keepdims=True)                    # (tb, 1)
        row_sum = jnp.sum(l_s[...] * jnp.exp(m_l - row_max),
                          axis=-1, keepdims=True)
        lse = row_max + jnp.log(row_sum)
        s_row = jnp.sum(s_s[...], axis=-1, keepdims=True)
        n_row = jnp.sum(n_s[...], axis=-1, keepdims=True)
        per_row = n_row * lse - s_row                                      # (tb, 1)
        # Ragged batch tile: rows >= B contain garbage -> zero their contribution.
        row = i * tile_b + lax.broadcasted_iota(jnp.int32, (tile_b, 1), 0)
        per_row = jnp.where(row < B, per_row, 0.0)
        partial = jnp.sum(per_row)
        # Dense (8,128) output slab per batch tile: partial at [0,0], zeros elsewhere.
        r8 = lax.broadcasted_iota(jnp.int32, (8, 128), 0)
        c8 = lax.broadcasted_iota(jnp.int32, (8, 128), 1)
        out_ref[...] = jnp.where((r8 == 0) & (c8 == 0), partial, 0.0)


# --------------------------------------------------------------------------
# Wrapper: no HBM-side pad / cast / mask materialization.
# --------------------------------------------------------------------------
def myloss_forward(pred, tar, *, tile_b=None, tile_c=None):
    """loss = -sum(log(softmax(pred, axis=1)[tar == 1]))  (MyLoss.forward)."""
    B, C = pred.shape
    assert tar.shape == (B, C)

    pred_bytes = jnp.dtype(pred.dtype).itemsize
    tar_bytes = jnp.dtype(tar.dtype).itemsize

    # Batch tile: full batch when small (block == array dim -> always legal for
    # any dtype); otherwise 256 rows per tile (multiple of every sublane pack)
    # so the leading grid axis can be "parallel" across v7x TensorCores.
    if tile_b is None:
        tile_b = B if B <= 256 else 256

    # Class tile: lane-dense (multiple of 128), sized so double-buffered input
    # blocks stay within a v7x-safe VMEM budget (~16 MiB of blocks).
    if tile_c is None:
        budget = 16 * 1024 * 1024
        tile_c = budget // (2 * max(tile_b, 8) * (pred_bytes + tar_bytes))
        tile_c = min(max(tile_c, 512), 4096)
    tile_c = max(128, (tile_c // 128) * 128)
    tile_c = min(tile_c, _round_up(C, 128))

    nb = pl.cdiv(B, tile_b)
    nc = pl.cdiv(C, tile_c)

    kernel = functools.partial(_myloss_kernel, B=B, C=C,
                               tile_b=tile_b, tile_c=tile_c)

    # TODO(synk): if tar is guaranteed strictly one-hot, the whole tar stream
    # could be replaced by scalar-prefetched label indices (halves HBM traffic).
    partials = pl.pallas_call(
        kernel,
        out_shape=jax.ShapeDtypeStruct((nb * 8, 128), jnp.float32),
        grid_spec=pltpu.PrefetchScalarGridSpec(
            num_scalar_prefetch=0,
            grid=(nb, nc),
            in_specs=[
                pl.BlockSpec((tile_b, tile_c), lambda i, j: (i, j)),
                pl.BlockSpec((tile_b, tile_c), lambda i, j: (i, j)),
            ],
            out_specs=pl.BlockSpec((8, 128), lambda i, j: (i, 0)),
            scratch_shapes=[pltpu.VMEM((tile_b, 128), jnp.float32)] * 4,
        ),
        compiler_params=pltpu.CompilerParams(
            dimension_semantics=("parallel", "arbitrary"),
            vmem_limit_bytes=48 * 1024 * 1024,
        ),
    )(pred, tar)
    return jnp.sum(partials)


# --------------------------------------------------------------------------
# Pure-JAX reference mirroring the PyTorch module
# --------------------------------------------------------------------------
def ref_loss(pred, tar):
    logp = jax.nn.log_softmax(pred.astype(jnp.float32), axis=1)
    return -jnp.sum(jnp.where(tar == 1, logp, 0.0))


if __name__ == "__main__":
    key = jax.random.PRNGKey(0)
    k1, k2, k3, k4, k5, k6 = jax.random.split(key, 6)

    # Case 1: small one-hot target, several ragged class tiles (C=300, tile_c=128).
    B, C = 4, 300
    pred1 = jax.random.normal(k1, (B, C), jnp.float32)
    labels1 = jax.random.randint(k2, (B,), 0, C)
    tar1 = jax.nn.one_hot(labels1, C, dtype=jnp.float32)
    out1 = jax.block_until_ready(myloss_forward(pred1, tar1, tile_c=128))
    ref1 = ref_loss(pred1, tar1)
    assert jnp.isfinite(out1), float(out1)
    assert jnp.allclose(out1, ref1, rtol=1e-4, atol=1e-3), (float(out1), float(ref1))

    # Case 2: general multi-positive mask, default (adaptive) tiling.
    B, C = 12, 1000
    pred2 = 3.0 * jax.random.normal(k3, (B, C), jnp.float32)
    tar2 = (jax.random.uniform(k4, (B, C)) < 0.05).astype(jnp.float32)
    out2 = jax.block_until_ready(myloss_forward(pred2, tar2))
    ref2 = ref_loss(pred2, tar2)
    assert jnp.allclose(out2, ref2, rtol=1e-4, atol=1e-2), (float(out2), float(ref2))

    # Case 3: batch-tiled ("parallel") path with ragged batch and class tiles.
    B, C = 300, 700
    pred3 = jax.random.normal(k5, (B, C), jnp.float32)
    labels3 = jax.random.randint(k6, (B,), 0, C)
    tar3 = jax.nn.one_hot(labels3, C, dtype=jnp.float32)
    out3 = jax.block_until_ready(myloss_forward(pred3, tar3, tile_c=256))
    ref3 = ref_loss(pred3, tar3)
    assert jnp.allclose(out3, ref3, rtol=1e-4, atol=1e-2), (float(out3), float(ref3))

    print("KERNEL_OK")
</pallas_src>

<mosaic_0001>
module attributes {stable_mosaic.version = 11 : i64} {
  func.func @_myloss_kernel(%arg0: i32, %arg1: i32, %arg2: memref<4x128xf32, #tpu.memory_space<vmem>>, %arg3: memref<4x128xf32, #tpu.memory_space<vmem>>, %arg4: memref<8x128xf32, #tpu.memory_space<vmem>>, %arg5: memref<4x128xf32, #tpu.memory_space<vmem>>, %arg6: memref<4x128xf32, #tpu.memory_space<vmem>>, %arg7: memref<4x128xf32, #tpu.memory_space<vmem>>, %arg8: memref<4x128xf32, #tpu.memory_space<vmem>>) attributes {dimension_semantics = [#tpu.dimension_semantics<parallel>, #tpu.dimension_semantics<arbitrary>], iteration_bounds = array<i64: 1, 3>, scalar_prefetch = 0 : i64, scratch_operands = 4 : i64, tpu.core_type = #tpu.core_type<tc>, window_params = [{transform_indices = @transform_0, window_bounds = array<i64: 4, 128>}, {transform_indices = @transform_1, window_bounds = array<i64: 4, 128>}, {transform_indices = @transform_2, window_bounds = array<i64: 8, 128>}]} {
    %c0_i32 = arith.constant 0 : i32
    %0 = arith.cmpi eq, %arg1, %c0_i32 : i32
    %1 = arith.extui %0 : i1 to i32
    %c0_i32_0 = arith.constant 0 : i32
    %2 = arith.cmpi ne, %1, %c0_i32_0 : i32
    scf.if %2 {
      %cst_22 = arith.constant 0xFF800000 : f32
      %39 = vector.broadcast %cst_22 : f32 to vector<4x128xf32>
      %c0_23 = arith.constant 0 : index
      %c0_24 = arith.constant 0 : index
      %40 = vector.load %arg5[%c0_23, %c0_24] : memref<4x128xf32, #tpu.memory_space<vmem>>, vector<4x128xf32>
      tpu.vector_store %arg5[%c0_23, %c0_24], %39 {strides = array<i32>} : memref<4x128xf32, #tpu.memory_space<vmem>>, vector<4x128xf32>,
      %cst_25 = arith.constant 0.000000e+00 : f32
      %41 = vector.broadcast %cst_25 : f32 to vector<4x128xf32>
      %c0_26 = arith.constant 0 : index
      %c0_27 = arith.constant 0 : index
      %42 = vector.load %arg6[%c0_26, %c0_27] : memref<4x128xf32, #tpu.memory_space<vmem>>, vector<4x128xf32>
      tpu.vector_store %arg6[%c0_26, %c0_27], %41 {strides = array<i32>} : memref<4x128xf32, #tpu.memory_space<vmem>>, vector<4x128xf32>,
      %cst_28 = arith.constant 0.000000e+00 : f32
      %43 = vector.broadcast %cst_28 : f32 to vector<4x128xf32>
      %c0_29 = arith.constant 0 : index
      %c0_30 = arith.constant 0 : index
      %44 = vector.load %arg7[%c0_29, %c0_30] : memref<4x128xf32, #tpu.memory_space<vmem>>, vector<4x128xf32>
      tpu.vector_store %arg7[%c0_29, %c0_30], %43 {strides = array<i32>} : memref<4x128xf32, #tpu.memory_space<vmem>>, vector<4x128xf32>,
      %cst_31 = arith.constant 0.000000e+00 : f32
      %45 = vector.broadcast %cst_31 : f32 to vector<4x128xf32>
      %c0_32 = arith.constant 0 : index
      %c0_33 = arith.constant 0 : index
      %46 = vector.load %arg8[%c0_32, %c0_33] : memref<4x128xf32, #tpu.memory_space<vmem>>, vector<4x128xf32>
      tpu.vector_store %arg8[%c0_32, %c0_33], %45 {strides = array<i32>} : memref<4x128xf32, #tpu.memory_space<vmem>>, vector<4x128xf32>,
    } else {
    }
    %c0 = arith.constant 0 : index
    %c0_1 = arith.constant 0 : index
    %3 = vector.load %arg2[%c0, %c0_1] : memref<4x128xf32, #tpu.memory_space<vmem>>, vector<4x128xf32>
    %c0_2 = arith.constant 0 : index
    %c0_3 = arith.constant 0 : index
    %4 = vector.load %arg3[%c0_2, %c0_3] : memref<4x128xf32, #tpu.memory_space<vmem>>, vector<4x128xf32>
    %cst = arith.constant 1.000000e+00 : f32
    %5 = vector.broadcast %cst : f32 to vector<4x128xf32>
    %6 = arith.cmpf oeq, %4, %5 : vector<4x128xf32>
    %c128_i32 = arith.constant 128 : i32
    %7 = arith.muli %arg1, %c128_i32 : i32
    %8 = tpu.iota {dimensions = array<i32: 1>} : vector<4x128xi32>
    %9 = vector.broadcast %7 : i32 to vector<4x128xi32>
    %10 = arith.addi %9, %8 : vector<4x128xi32>
    %c300_i32 = arith.constant 300 : i32
    %11 = vector.broadcast %c300_i32 : i32 to vector<4x128xi32>
    %12 = arith.cmpi slt, %10, %11 : vector<4x128xi32>
    %cst_4 = arith.constant -1.000000e+30 : f32
    %13 = vector.broadcast %cst_4 : f32 to vector<4x128xf32>
    %14 = arith.select %12, %3, %13 : vector<4x128xi1>, vector<4x128xf32>
    %15 = arith.andi %12, %6 : vector<4x128xi1>
    %16 = arith.extui %15 : vector<4x128xi1> to vector<4x128xi32>
    %17 = arith.sitofp %16 : vector<4x128xi32> to vector<4x128xf32>
    %c0_5 = arith.constant 0 : index
    %c0_6 = arith.constant 0 : index
    %18 = vector.load %arg5[%c0_5, %c0_6] : memref<4x128xf32, #tpu.memory_space<vmem>>, vector<4x128xf32>
    %19 = arith.maximumf %18, %14 : vector<4x128xf32>
    %20 = arith.subf %18, %19 : vector<4x128xf32>
    %21 = math.exp %20 : vector<4x128xf32>
    %c0_7 = arith.constant 0 : index
    %c0_8 = arith.constant 0 : index
    %22 = vector.load %arg6[%c0_7, %c0_8] : memref<4x128xf32, #tpu.memory_space<vmem>>, vector<4x128xf32>
    %23 = arith.mulf %21, %22 : vector<4x128xf32>
    %c0_9 = arith.constant 0 : index
    %c0_10 = arith.constant 0 : index
    %24 = vector.load %arg7[%c0_9, %c0_10] : memref<4x128xf32, #tpu.memory_space<vmem>>, vector<4x128xf32>
    %c0_11 = arith.constant 0 : index
    %c0_12 = arith.constant 0 : index
    %25 = vector.load %arg8[%c0_11, %c0_12] : memref<4x128xf32, #tpu.memory_space<vmem>>, vector<4x128xf32>
    %26 = arith.subf %14, %19 : vector<4x128xf32>
    %27 = math.exp %26 : vector<4x128xf32>
    %28 = arith.addf %23, %27 : vector<4x128xf32>
    %29 = arith.mulf %17, %14 : vector<4x128xf32>
    %30 = arith.addf %24, %29 : vector<4x128xf32>
    %31 = arith.addf %25, %17 : vector<4x128xf32>
    %c0_13 = arith.constant 0 : index
    %c0_14 = arith.constant 0 : index
    %32 = vector.load %arg5[%c0_13, %c0_14] : memref<4x128xf32, #tpu.memory_space<vmem>>, vector<4x128xf32>
    tpu.vector_store %arg5[%c0_13, %c0_14], %19 {strides = array<i32>} : memref<4x128xf32, #tpu.memory_space<vmem>>, vector<4x128xf32>,
    %c0_15 = arith.constant 0 : index
    %c0_16 = arith.constant 0 : index
    %33 = vector.load %arg6[%c0_15, %c0_16] : memref<4x128xf32, #tpu.memory_space<vmem>>, vector<4x128xf32>
    tpu.vector_store %arg6[%c0_15, %c0_16], %28 {strides = array<i32>} : memref<4x128xf32, #tpu.memory_space<vmem>>, vector<4x128xf32>,
    %c0_17 = arith.constant 0 : index
    %c0_18 = arith.constant 0 : index
    %34 = vector.load %arg7[%c0_17, %c0_18] : memref<4x128xf32, #tpu.memory_space<vmem>>, vector<4x128xf32>
    tpu.vector_store %arg7[%c0_17, %c0_18], %30 {strides = array<i32>} : memref<4x128xf32, #tpu.memory_space<vmem>>, vector<4x128xf32>,
    %c0_19 = arith.constant 0 : index
    %c0_20 = arith.constant 0 : index
    %35 = vector.load %arg8[%c0_19, %c0_20] : memref<4x128xf32, #tpu.memory_space<vmem>>, vector<4x128xf32>
    tpu.vector_store %arg8[%c0_19, %c0_20], %31 {strides = array<i32>} : memref<4x128xf32, #tpu.memory_space<vmem>>, vector<4x128xf32>,
    %c2_i32 = arith.constant 2 : i32
    %36 = arith.cmpi eq, %arg1, %c2_i32 : i32
    %37 = arith.extui %36 : i1 to i32
    %c0_i32_21 = arith.constant 0 : i32
    %38 = arith.cmpi ne, %37, %c0_i32_21 : i32
    scf.if %38 {
      %c0_22 = arith.constant 0 : index
      %c0_23 = arith.constant 0 : index
      %39 = vector.load %arg5[%c0_22, %c0_23] : memref<4x128xf32, #tpu.memory_space<vmem>>, vector<4x128xf32>
      %cst_24 = arith.constant dense<0xFF800000> : vector<4xf32>
      %40 = vector.multi_reduction <maximumf>, %39, %cst_24 [1] : vector<4x128xf32> to vector<4xf32>
      %41 = vector.shape_cast %40 : vector<4xf32> to vector<4x1xf32>
      %c0_25 = arith.constant 0 : index
      %c0_26 = arith.constant 0 : index
      %42 = vector.load %arg6[%c0_25, %c0_26] : memref<4x128xf32, #tpu.memory_space<vmem>>, vector<4x128xf32>
      %43 = vector.broadcast %41 : vector<4x1xf32> to vector<4x128xf32>
      %44 = arith.subf %39, %43 : vector<4x128xf32>
      %45 = math.exp %44 : vector<4x128xf32>
      %46 = arith.mulf %42, %45 : vector<4x128xf32>
      %cst_27 = arith.constant dense<0.000000e+00> : vector<4xf32>
      %47 = vector.multi_reduction <add>, %46, %cst_27 [1] : vector<4x128xf32> to vector<4xf32>
      %48 = vector.shape_cast %47 : vector<4xf32> to vector<4x1xf32>
      %49 = math.log %48 : vector<4x1xf32>
      %50 = arith.addf %41, %49 : vector<4x1xf32>
      %c0_28 = arith.constant 0 : index
      %c0_29 = arith.constant 0 : index
      %51 = vector.load %arg7[%c0_28, %c0_29] : memref<4x128xf32, #tpu.memory_space<vmem>>, vector<4x128xf32>
      %cst_30 = arith.constant dense<0.000000e+00> : vector<4xf32>
      %52 = vector.multi_reduction <add>, %51, %cst_30 [1] : vector<4x128xf32> to vector<4xf32>
      %53 = vector.shape_cast %52 : vector<4xf32> to vector<4x1xf32>
      %c0_31 = arith.constant 0 : index
      %c0_32 = arith.constant 0 : index
      %54 = vector.load %arg8[%c0_31, %c0_32] : memref<4x128xf32, #tpu.memory_space<vmem>>, vector<4x128xf32>
      %cst_33 = arith.constant dense<0.000000e+00> : vector<4xf32>
      %55 = vector.multi_reduction <add>, %54, %cst_33 [1] : vector<4x128xf32> to vector<4xf32>
      %56 = vector.shape_cast %55 : vector<4xf32> to vector<4x1xf32>
      %57 = arith.mulf %56, %50 : vector<4x1xf32>
      %58 = arith.subf %57, %53 : vector<4x1xf32>
      %c4_i32 = arith.constant 4 : i32
      %59 = arith.muli %arg0, %c4_i32 : i32
      %60 = tpu.iota {dimensions = array<i32: 0>} : vector<4x1xi32>
      %61 = vector.broadcast %59 : i32 to vector<4x1xi32>
      %62 = arith.addi %61, %60 : vector<4x1xi32>
      %c4_i32_34 = arith.constant 4 : i32
      %63 = vector.broadcast %c4_i32_34 : i32 to vector<4x1xi32>
      %64 = arith.cmpi slt, %62, %63 : vector<4x1xi32>
      %cst_35 = arith.constant 0.000000e+00 : f32
      %65 = vector.broadcast %cst_35 : f32 to vector<4x1xf32>
      %66 = arith.select %64, %58, %65 : vector<4x1xi1>, vector<4x1xf32>
      %67 = vector.shape_cast %66 : vector<4x1xf32> to vector<1x4x1xf32>
      %cst_36 = arith.constant dense<0.000000e+00> : vector<1xf32>
      %68 = vector.multi_reduction <add>, %67, %cst_36 [1, 2] : vector<1x4x1xf32> to vector<1xf32>
      %69 = vector.shape_cast %68 : vector<1xf32> to vector<1x1x1xf32>
      %70 = vector.extract %69[0, 0, 0] : f32 from vector<1x1x1xf32>
      %71 = tpu.iota {dimensions = array<i32: 0>} : vector<8x128xi32>
      %72 = tpu.iota {dimensions = array<i32: 1>} : vector<8x128xi32>
      %c0_i32_37 = arith.constant 0 : i32
      %73 = vector.broadcast %c0_i32_37 : i32 to vector<8x128xi32>
      %74 = arith.cmpi eq, %71, %73 : vector<8x128xi32>
      %c0_i32_38 = arith.constant 0 : i32
      %75 = vector.broadcast %c0_i32_38 : i32 to vector<8x128xi32>
      %76 = arith.cmpi eq, %72, %75 : vector<8x128xi32>
      %77 = arith.andi %74, %76 : vector<8x128xi1>
      %cst_39 = arith.constant 0.000000e+00 : f32
      %78 = vector.broadcast %70 : f32 to vector<8x128xf32>
      %79 = vector.broadcast %cst_39 : f32 to vector<8x128xf32>
      %80 = arith.select %77, %78, %79 : vector<8x128xi1>, vector<8x128xf32>
      %c0_40 = arith.constant 0 : index
      %c0_41 = arith.constant 0 : index
      %81 = vector.load %arg4[%c0_40, %c0_41] : memref<8x128xf32, #tpu.memory_space<vmem>>, vector<8x128xf32>
      tpu.vector_store %arg4[%c0_40, %c0_41], %80 {strides = array<i32>} : memref<8x128xf32, #tpu.memory_space<vmem>>, vector<8x128xf32>,
    } else {
    }
    return
  }
  func.func @transform_0(%arg0: i32, %arg1: i32) -> (i32, i32) {
    %c0_i32 = arith.constant 0 : i32
    return %arg0, %arg1 : i32, i32
  }
  func.func @transform_1(%arg0: i32, %arg1: i32) -> (i32, i32) {
    %c0_i32 = arith.constant 0 : i32
    return %arg0, %arg1 : i32, i32
  }
  func.func @transform_2(%arg0: i32, %arg1: i32) -> (i32, i32) {
    %c0_i32 = arith.constant 0 : i32
    %c0_i32_0 = arith.constant 0 : i32
    return %arg0, %c0_i32 : i32, i32
  }
}

</mosaic_0001>

<bundles_post_ra>
// kernel: tpu_custom_call.1
= control target key start
LH: loop header
LB: loop body
LE: loop exit
PB: predicated region body
PF: predicated region fallthrough
CT: control target
= control target key end

     0   :  { %7 = vsyncpa [#allocation7], 0  ;;  %s780_s0 = inlined_call_operand.hbm [shape: f32[4,300], index: 0, kind: input, shape index: {}]   ;;  %s781_s1 = inlined_call_operand.hbm [shape: f32[4,300], index: 1, kind: input, shape index: {}]   ;;  %s782_s2 = inlined_call_operand.hbm [shape: f32[8,128], index: 2, kind: output, shape index: {}]  }
   0x1   :  { %9 = vsyncpa [#allocation7 + $0x1], 0 }
   0x2   :  { %10 = vsyncpa [#allocation10], 0 }
   0x3   :  { %12 = vsyncpa [#allocation10 + $0x1], 0 }
   0x4   :  { %13 = vsyncpa [#allocation8], 0  ;;  %s672_s9 = smov 0   ;;  %s674_s10 = smov 0  }
   0x5   :  { %s676_s11 = smov 0   ;;  %s678_s12 = smov 0  }
   0x6   :  { %s680_s13 = smov 0   ;;  %s682_s14 = smov 0  }
   0x7 LB: > { %s407_s15 = sadd.s32 4294967295, %s651_s14   ;;  %s28_s16 = sadd.s32 1, %s647_s13  ;;  %s651_s14 = sphi %s682_s14, %s19_s14   ;;  %s647_s13 = sphi %s680_s13, %s789_s13   ;;  %s643_s12 = sphi %s678_s12, %s788_s12   ;;  %s639_s11 = sphi %s676_s11, %s787_s11   ;;  %s635_s10 = sphi %s674_s10, %s786_s10   ;;  %s631_s9 = sphi %s672_s9, %s785_s9  }
   0x8   : > { %p29_p0 = scmp.ge.s32.totalorder %s28_s16, 3  ;;  %s40_s17 = sadd.s32 1, %s639_s11 }
   0x9   : > { %p47_p1 = scmp.ne.s32.totalorder %s639_s11, %s635_s10  ;;  %p48_p2 = scmp.eq.s32.totalorder %s651_s14, 0 }
   0xa   : > { %s791_s16 = smov (%p29_p0, %s28_s16), 0  ;;  %p53_p4 = scmp.ne.s32.totalorder %s635_s10, %s631_s9 }
   0xb   : > { %p708_p3 = por %p48_p2, %p47_p1  ;;  %s36_s19 = ssub.s32 %s647_s13, %s791_s16 }
   0xc   : > { %p54_p5 = scmp.eq.s32.totalorder %s407_s15, 0  ;;  %p38_p6 = scmp.eq.s32.totalorder %s36_s19, 0 }
   0xd   : > { %p442_p8 = scmp.lt.s32.totalorder %s651_s14, 3  ;;  %s131_s22 = sand.u32 1, %s639_s11  }
   0xe   : > { %p717_p7 = por %p54_p5, %p53_p4  ;;  %s411_s23 = sshll.u32 %s647_s13, 2 }
   0xf   : > { %s723_s21 = scalar_select %p38_p6, %s639_s11, %s40_s17  }
  0x10   : > { %s410_s24 = sshll.u32 %s131_s22, 2  ;;  %s141_s27 = scalar_lea.hbm %s780_s0, %s411_s23 }
  0x11   : > { %s143_s28 = sshll.u32 %s141_s27, 4  ;;  %s135_s29 = scalar_lea.vmem [#allocation6], %s410_s24  ;;  %s144_s28 = int_to_ptr.hbm [resolvable:$true] %s143_s28 }
  0x12   : > { %s145_s30 = sshll.u32 %s135_s29, 4  ;;  %p436_p9 = pnand %p442_p8, %p708_p3  ;;  %s146_s30 = int_to_ptr.vmem [resolvable:$true] %s145_s30 }
  0x13   : > { %p414_p10 = scmp.ge.s32.totalorder %s651_s14, 1  ;;  %p171_p11 = scmp.lt.s32.totalorder %s651_s14, 4 }
  0x14   : > { %s132_s3 = scalar_lea.sflag [#allocation7], %s131_s22  ;;  %s162_s6 = scalar_lea.hbm %s781_s1, %s411_s23 }
  0x15   : > { %438 = dma.hbm_to_vmem [thread:$0]  (!%p436_p9), %s144_s28, 64, %s146_s30, %s132_s3  }
  0x16   : > { %p172_p12 = pnand %p414_p10, %p171_p11  ;;  %s164_s7 = sshll.u32 %s162_s6, 4  ;;  %s165_s7 = int_to_ptr.hbm [resolvable:$true] %s164_s7 }
  0x17   : > { %s156_s8 = scalar_lea.vmem [#allocation9], %s410_s24  ;;  %s153_s17 = scalar_lea.sflag [#allocation10], %s131_s22 }
  0x18   : > { %s166_s9 = sshll.u32 %s156_s8, 4  ;;  %175 = sbr.rel (%p172_p12) target bundleno = 522 (0x20a), region = 28  ;;  %s167_s9 = int_to_ptr.vmem [resolvable:$true] %s166_s9 }
  0x19   : > { %441 = dma.hbm_to_vmem [thread:$0]  (!%p436_p9), %s165_s7, 64, %s167_s9, %s153_s17  }
  0x1a   : > { %s177_s18 = sand.u32 (!%p172_p12), 1, %s635_s10  }
  0x1b   : > { %s415_s19 = sshll.u32 (!%p172_p12), %s177_s18, 2  ;;  %s178_s25 = scalar_lea.sflag (!%p172_p12), [#allocation7], %s177_s18 }
  0x1c   : > { %s181_s26 = scalar_lea.vmem (!%p172_p12), [#allocation6], %s415_s19 }
  0x1d   : > { %618 = dma.done.wait (%p717_p7), %s178_s25, 64  }
  0x1e   : > { %620 = vsyncadd (%p717_p7), %s178_s25, 4294967232  ;;  %s188_s23 = scalar_lea.sflag [#allocation10], %s177_s18  ;;  %s191_s24 = scalar_lea.vmem [#allocation9], %s415_s19 }
  0x1f   : > { %622 = dma.done.wait (%p717_p7), %s188_s23, 64  }
  0x20   : > { %624 = vsyncadd (%p717_p7), %s188_s23, 4294967232  ;;  %p417_p13 = scmp.ne.s32.totalorder %s643_s12, 0 }
  0x22   : > { %216 = sbr.rel (%p417_p13) target bundleno = 44 (0x2c), region = 40 }
  0x27   : > { %v653_v0 = vmov -inf   ;;  %v654_v1 = vmov 0.0  }
  0x28   : > { %217 = vst [vmem:[#allocation2] sm:$0xf] %v653_v0 }
  0x29   : > { %218 = vst [vmem:[#allocation3] sm:$0xf] %v654_v1 }
  0x2a   : > { %219 = vst [vmem:[#allocation4] sm:$0xf] %v654_v1 }
  0x2b   : > { %220 = vst [vmem:[#allocation5] sm:$0xf] %v654_v1 }
  0x2c PF: > { %s418_s22 = sshll.u32 %s643_s12, 7  ;;  %v225_v2 = vlaneseq  ;;  %v222_v4 = vld [vmem:[%s191_s24] sm:$0xf]  ;;  %v221_v6 = vld [vmem:[%s181_s26] sm:$0xf]  ;;  %v655_v12 = vmov 0.0  }
  0x2d   : > { %v227_v3 = vstv %s418_s22  ;;  %vm223_vm0 = vcmp.eq.f32.partialorder %v222_v4, 1.0  ;;  %p420_p0 = scmp.ne.s32.totalorder %s643_s12, 2 }
  0x2e   : > { %v748_v5 = vand.u32 127, %v225_v2 }
  0x2f   : > { %v234_v8 = vld [vmem:[#allocation2] sm:$0xf] }
  0x30   : > { %v228_v7 = vadd.s32 %v227_v3, %v748_v5  ;;  %v239_v22 = vld [vmem:[#allocation3] sm:$0xf] }
  0x31   : > { %v241_v14 = vld [vmem:[#allocation4] sm:$0xf] }
  0x32   : > { %vm229_vm1 = vcmp.lt.s32.totalorder %v228_v7, 300  ;;  %v242_v9 = vld [vmem:[#allocation5] sm:$0xf] }
  0x33   : > { %v230_v10 = vsel %vm229_vm1, %v221_v6, -1e+30  ;;  %vm231_vm2 = vmand %vm229_vm1, %vm223_vm0 }
  0x34   : > { %v235_v11 = vmax.f32 %v234_v8, %v230_v10  ;;  %v419_v13 = vsel %vm231_vm2, 1.0, %v655_v12 }
  0x35   : > { %v247_v15 = vmul.f32 %v419_v13, %v230_v10  ;;  %v249_v16 = vadd.f32 %v419_v13, %v242_v9 }
  0x36   : > { %v236_v17 = vsub.f32 %v234_v8, %v235_v11  ;;  %v243_v18 = vsub.f32 %v230_v10, %v235_v11  ;;  %250 = vst [vmem:[#allocation2] sm:$0xf] %v235_v11 }
  0x37   : > { %v248_v19 = vadd.f32 %v247_v15, %v241_v14  ;;  %253 = vst [vmem:[#allocation5] sm:$0xf] %v249_v16 }
  0x38   : > { %v237_v20 = vmul.f32 1.442695, %v236_v17  ;;  %v244_v21 = vmul.f32 1.442695, %v243_v18 }
  0x39   : > { %252 = vst [vmem:[#allocation4] sm:$0xf] %v248_v19 }
  0x3a   : > { %497 = vpow2.f32 %v237_v20 }
  0x3b   : > { %499 = vpow2.f32 %v244_v21 }
  0x40   : > { %v498_v23 = vpop.eup %497 }
  0x41   : > { %v500_v24 = vpop.eup %499  ;;  %v240_v25 = vmul.f32 %v498_v23, %v239_v22  ;;  %257 = sbr.rel (%p420_p0) target bundleno = 516 (0x204), region = 44 }
  0x43   : > { %v246_v26 = vadd.f32 %v500_v24, %v240_v25 }
  0x45   : > { %251 = vst [vmem:[#allocation3] sm:$0xf] %v246_v26 }
  0x46   : > { %v258_v27 = vld [vmem:[#allocation2] sm:$0xf]  ;;  %vm259_vm3 = vcmask 1043456   ;;  %v278_v29 = vld [vmem:[#allocation5] sm:$0xf]  ;;  %v286_v44 = vshrl.u32 %v225_v2, 7 }
  0x47   : > { %v260_v28 = vsel %vm259_vm3, %v258_v27, -inf  ;;  %v279_v30 = vsel %vm259_vm3, %v278_v29, 0.0  ;;  %v274_v31 = vld [vmem:[#allocation4] sm:$0xf]  ;;  %vm291_vm5 = vcmask 3072   ;;  %vm303_vm7 = vcmp.eq.s32.totalorder %v748_v5, 0 }
  0x48   : > { %261 = vmax.xlane.f32.xlu0 %v260_v28  ;;  %280 = vadd.xlane.f32.xlu1 %v279_v30  ;;  %v275_v32 = vsel %vm259_vm3, %v274_v31, 0.0  ;;  %vm289_vm4 = vcmp.lt.s32.totalorder %v286_v44, 4  ;;  %vm302_vm6 = vcmp.eq.s32.totalorder %v286_v44, 0 }
  0x49   : > { %vm304_vm8 = vmand %vm302_vm6, %vm303_vm7 }
  0x4c   : > { %v263_v36 = vld [vmem:[#allocation3] sm:$0xf] }
  0x50   : > { %276 = vadd.xlane.f32.xlu1 %v275_v32 }
  0xbb   : > { %v262_v33 = vpop.xlane.xlu0 %261  ;;  %v281_v41 = vpop.xlane.xlu1 %280 }
  0xbc   : > { %v264_v34 = vsub.f32 %v258_v27, %v262_v33 }
  0xbe   : > { %v265_v35 = vmul.f32 1.442695, %v264_v34 }
  0xc0   : > { %501 = vpow2.f32 %v265_v35 }
  0xc3   : > { %v277_v46 = vpop.xlane.xlu1 %276 }
  0xc6   : > { %v502_v37 = vpop.eup %501 }
  0xc7   : > { %v267_v38 = vmul.f32 %v502_v37, %v263_v36 }
  0xc9   : > { %v268_v39 = vsel %vm259_vm3, %v267_v38, 0.0 }
  0xca   : > { %269 = vadd.xlane.f32.xlu0 %v268_v39 }
 0x13d   : > { %v270_v40 = vpop.xlane.xlu0 %269 }
 0x13e   : > { %503 = vlog2.f32 %v270_v40 }
 0x144   : > { %v504_v42 = vpop.eup %503 }
 0x145   : > { %v272_v43 = vmul.f32 0.6931472, %v504_v42 }
 0x147   : > { %v273_v45 = vadd.f32 %v272_v43, %v262_v33 }
 0x149   : > { %v282_v47 = vmul.f32 %v281_v41, %v273_v45 }
 0x14b   : > { %v283_v48 = vsub.f32 %v282_v47, %v277_v46 }
 0x14d   : > { %v290_v49 = vsel %vm289_vm4, %v283_v48, 0.0 }
 0x14e   : > { %v292_v50 = vsel %vm291_vm5, %v290_v49, 0.0 }
 0x14f   : > { %293 = vadd.xlane.f32.xlu2 %v292_v50 }
 0x1c2   : > { %v294_v51 = vpop.xlane.xlu2 %293 }
 0x1c3   : > { %v295_v52 = vrot.slane %v294_v51, 4 }
 0x1c5   : > { %v296_v53 = vadd.f32 %v295_v52, %v294_v51 }
 0x1c7   : > { %v297_v54 = vrot.slane %v296_v53, 2 }
 0x1c9   : > { %v298_v55 = vadd.f32 %v297_v54, %v296_v53 }
 0x1cb   : > { %v299_v56 = vrot.slane %v298_v55, 1 }
 0x1cd   : > { %v300_v57 = vadd.f32 %v299_v56, %v298_v55 }
 0x1cf   : > { %425 = vpush %v300_v57 }
 0x200   : > { %s426_s12 = spop %425 }
 0x201   : > { %v305_v58 = vstv %s426_s12 }
 0x202   : > { %v306_v59 = vsel %vm304_vm8, %v305_v58, 0.0 }
 0x203   : > { %307 = vst [vmem:[#allocation11] sm:$0xff] %v306_v59 }
 0x204 PF: > { %p443_p1 = scmp.eq.s32.totalorder %s407_s15, 2  ;;  %s318_s28 = sshll.u32 %s782_s2, 4  ;;  %s319_s28 = int_to_ptr.hbm [resolvable:$true] %s318_s28 }
 0x205   : > { %s656_s29 = smov [#allocation11]  }
 0x206   : > { %s316_s30 = sshll.u32 %s656_s29, 4  ;;  %s317_s30 = int_to_ptr.vmem [resolvable:$true] %s316_s30 }
 0x207   : > { %432 = dma.vmem_to_hbm [thread:$0]  (%p443_p1), %s317_s30, 128, %s319_s28, [#allocation8]  }
 0x208   : > { %626 = dma.done.wait (%p443_p1), [#allocation8], 128  }
 0x209   : > { %628 = vsyncadd (%p443_p1), [#allocation8], 4294967168 }
 0x20a PF: > { %s19_s14 = sadd.s32 1, %s651_s14   ;;  %s785_s9 = smov %s635_s10 }
 0x20b   : > { %p16_p2 = scmp.ge.s32.totalorder %s19_s14, 5   ;;  %s786_s10 = smov %s639_s11 }
 0x20c   : > { %s787_s11 = smov %s723_s21  ;;  %s788_s12 = smov %s647_s13 }
 0x20d   : > { %s789_s13 = smov %s791_s16  ;;  %18 = sbr.rel (!%p16_p2) target bundleno = 7 (0x7), region = 87 }
 0x212   :  { %332 = vsyncpa [#allocation7], 1 }
 0x213   :  { %334 = vsyncpa [#allocation7 + $0x1], 1 }
 0x214   :  { %335 = vsyncpa [#allocation10], 1 }
 0x215   :  { %337 = vsyncpa [#allocation10 + $0x1], 1 }
 0x216   :  { %338 = vsyncpa [#allocation8], 1 }
 0x217   :  { %340 = vsyncpa [#allocation8 + $0x1], 1 }

</bundles_post_ra>
